<compile_context>
chip_gen: v7x
topology: tpu7x:2x2x1
jax: 0.10.0
libtpu: 0.0.40
codegen_flags: <defaults>
</compile_context>

<pallas_src>
import math

import jax
import jax.numpy as jnp
from jax.experimental import pallas as pl
from jax.experimental.pallas import tpu as pltpu


# ----------------------------------------------------------------------------
# Kernel body: o = x0 (+ w[i] * x_i for i >= 1), elementwise over (TM, 128).
# ----------------------------------------------------------------------------
def _make_weighted_sum_kernel(n, weighted):
    def kernel(w_ref, *refs):
        x_refs = refs[:n]
        o_ref = refs[n]
        # x[0] always has weight 1.0 -> seeds the accumulator directly.
        acc = x_refs[0][...].astype(jnp.float32)
        for i in range(1, n):
            xi = x_refs[i][...].astype(jnp.float32)
            if weighted:
                acc = acc + xi * w_ref[i]
            else:
                acc = acc + xi
        o_ref[...] = acc.astype(o_ref.dtype)

    return kernel


def _round_up(x, m):
    return ((x + m - 1) // m) * m


def _tile_and_vmem(M, n, dtype_bytes):
    """Pick the row-tile TM and a vmem_limit based on the chip's VMEM size."""
    vmem_phys = None
    try:
        info = pltpu.get_tpu_info()
        vmem_phys = getattr(info, "vmem_capacity_bytes", None)
        if not vmem_phys:
            vmem_phys = getattr(info, "vmem_bytes", None)
    except Exception:
        vmem_phys = None
    if not vmem_phys:
        vmem_phys = 64 * 1024 * 1024  # conservative default (v7x per-core)

    if vmem_phys >= 100 * 1024 * 1024:
        # v5e / v6e: 128 MiB physical VMEM -> large double-buffered slabs so
        # the ~0.35us per-grid-step overhead stays amortized even for large n.
        budget = 32 * 1024 * 1024
        tm_cap = 8192
        limit_cap = 64 * 1024 * 1024
    else:
        # v7x: 64 MiB physical VMEM -> smaller budget, leave headroom under
        # physical VMEM for compiler scratch.
        budget = 20 * 1024 * 1024
        tm_cap = 4096
        limit_cap = 40 * 1024 * 1024

    # Native element size: the (TM, 128) blocks live in VMEM in the input
    # dtype; the f32 accumulation is per-vreg, not a VMEM buffer.
    bytes_per_row = 128 * dtype_bytes
    tm = budget // ((n + 1) * 2 * bytes_per_row)
    tm = min(int(tm), tm_cap)

    if M <= 8:
        tm = M  # full-dim block (legal even if M is not a multiple of 8)
    else:
        # Keep >= 2 grid steps so the single "parallel" axis can be sharded
        # across TensorCores on v7x; keep TM a multiple of 8.
        tm = min(tm, _round_up(pl.cdiv(M, 2), 8))
        tm = max(8, (tm // 8) * 8)

    footprint = (n + 1) * 2 * tm * 128 * dtype_bytes  # double-buffered blocks
    vmem_limit = int(min(max(footprint + footprint // 2, 16 * 1024 * 1024),
                         limit_cap))
    return tm, vmem_limit


def _pallas_weighted_sum(slabs, weights, weighted):
    """slabs: list of n (M, 128) arrays (same shape/dtype). weights: (n,) f32."""
    n = len(slabs)
    M, N = slabs[0].shape
    dtype = slabs[0].dtype
    tm, vmem_limit = _tile_and_vmem(M, n, jnp.dtype(dtype).itemsize)
    grid = (pl.cdiv(M, tm),)  # partial last block is legal (TM multiple of 8)

    grid_spec = pltpu.PrefetchScalarGridSpec(
        num_scalar_prefetch=1,  # weights -> SMEM (float32)
        grid=grid,
        in_specs=[pl.BlockSpec((tm, N), lambda i, w: (i, 0)) for _ in range(n)],
        out_specs=pl.BlockSpec((tm, N), lambda i, w: (i, 0)),
    )

    return pl.pallas_call(
        _make_weighted_sum_kernel(n, weighted),
        out_shape=jax.ShapeDtypeStruct((M, N), dtype),
        grid_spec=grid_spec,
        compiler_params=pltpu.CompilerParams(
            dimension_semantics=("parallel",),  # M-tiles are independent
            vmem_limit_bytes=vmem_limit,
        ),
    )(weights, *slabs)


class SumPallas:
    """JAX/Pallas equivalent of models.experimental.Sum (forward pass)."""

    def __init__(self, n, weight=False):
        assert n >= 2
        self.n = n
        self.weight = weight
        if weight:
            # Deterministic init, same as PyTorch: -arange(1., n) / 2
            self.w = -jnp.arange(1.0, float(n), dtype=jnp.float32) / 2.0
        else:
            self.w = None
        # TODO(synk): training / autograd of the learned weights is out of
        # scope here (forward pass only).

    def __call__(self, x):
        n = self.n
        assert len(x) == n
        shape = x[0].shape
        dtype = x[0].dtype
        total = math.prod(shape)

        # Effective per-input weights (float32, SMEM scalar path):
        # x[0] gets 1.0; x[i>=1] gets sigmoid(w[i-1])*2, or 1.0 when weight=False.
        if self.weight:
            w_eff = jnp.concatenate(
                [jnp.ones((1,), jnp.float32), jax.nn.sigmoid(self.w) * 2.0]
            )
        else:
            w_eff = jnp.ones((n,), jnp.float32)

        flats = [xi.reshape(-1) for xi in x]  # free reshape (contiguous)

        main = (total // 128) * 128
        rem = total - main

        if rem == 0:
            # Fully 128-aligned: zero extra copies, one pass over HBM.
            slabs = [f.reshape(main // 128, 128) for f in flats]
            y = _pallas_weighted_sum(slabs, w_eff, self.weight)
            return y.reshape(shape)

        # Unaligned: kernel handles the 128-aligned prefix, the (<128)-element
        # tail is folded with plain JAX -- no full-array pad / slice-back copies.
        parts = []
        if main > 0:
            slabs = [f[:main].reshape(main // 128, 128) for f in flats]
            y_main = _pallas_weighted_sum(slabs, w_eff, self.weight).reshape(-1)
            parts.append(y_main)

        tail = flats[0][main:].astype(jnp.float32)
        for i in range(1, n):
            t = flats[i][main:].astype(jnp.float32)
            tail = tail + (t * w_eff[i] if self.weight else t)
        parts.append(tail.astype(dtype))

        y = jnp.concatenate(parts) if len(parts) > 1 else parts[0]
        return y.reshape(shape)


if __name__ == "__main__":
    key = jax.random.PRNGKey(0)
    n = 3
    B, C, H, W = 2, 4, 16, 16

    keys = jax.random.split(key, n)
    xs = [jax.random.normal(keys[i], (B, C, H, W), dtype=jnp.float32)
          for i in range(n)]

    # Weighted variant (weight=True), matching the PyTorch parameter init.
    module_w = SumPallas(n, weight=True)
    y_w = jax.block_until_ready(module_w(xs))

    # Reference in plain JAX (mirrors the PyTorch forward exactly).
    w_ref = jax.nn.sigmoid(module_w.w) * 2.0
    ref = xs[0]
    for i in range(n - 1):
        ref = ref + xs[i + 1] * w_ref[i]
    assert y_w.shape == ref.shape and y_w.dtype == ref.dtype
    assert jnp.allclose(y_w, ref, atol=1e-5, rtol=1e-5)

    # Unweighted variant (weight=False) — plain sum.
    module_u = SumPallas(n, weight=False)
    y_u = jax.block_until_ready(module_u(xs))
    ref_u = xs[0] + xs[1] + xs[2]
    assert jnp.allclose(y_u, ref_u, atol=1e-5, rtol=1e-5)

    # Non-multiple-of-128 total size — exercises the prefix + JAX-tail path.
    xs_odd = [jax.random.normal(keys[i], (2, 3, 5, 7), dtype=jnp.float32)
              for i in range(n)]
    y_odd = jax.block_until_ready(SumPallas(n, weight=True)(xs_odd))
    ref_odd = xs_odd[0]
    for i in range(n - 1):
        ref_odd = ref_odd + xs_odd[i + 1] * w_ref[i]
    assert jnp.allclose(y_odd, ref_odd, atol=1e-5, rtol=1e-5)

    # bf16 inputs — exercises the native-itemsize tile sizing.
    xs_bf = [x.astype(jnp.bfloat16) for x in xs]
    y_bf = jax.block_until_ready(SumPallas(n, weight=True)(xs_bf))
    assert y_bf.shape == xs_bf[0].shape and y_bf.dtype == jnp.bfloat16

    print("KERNEL_OK")
</pallas_src>

<mosaic_0001>
module attributes {stable_mosaic.version = 11 : i64} {
  func.func @kernel(%arg0: i32, %arg1: memref<3xf32, #tpu.memory_space<smem>>, %arg2: memref<8x128xf32, #tpu.memory_space<vmem>>, %arg3: memref<8x128xf32, #tpu.memory_space<vmem>>, %arg4: memref<8x128xf32, #tpu.memory_space<vmem>>, %arg5: memref<8x128xf32, #tpu.memory_space<vmem>>) attributes {dimension_semantics = [#tpu.dimension_semantics<parallel>], iteration_bounds = array<i64: 2>, scalar_prefetch = 1 : i64, scratch_operands = 0 : i64, tpu.core_type = #tpu.core_type<tc>, window_params = [{transform_indices = @transform_0, window_bounds = array<i64: 8, 128>}, {transform_indices = @transform_1, window_bounds = array<i64: 8, 128>}, {transform_indices = @transform_2, window_bounds = array<i64: 8, 128>}, {transform_indices = @transform_3, window_bounds = array<i64: 8, 128>}]} {
    %c0 = arith.constant 0 : index
    %c0_0 = arith.constant 0 : index
    %0 = vector.load %arg2[%c0, %c0_0] : memref<8x128xf32, #tpu.memory_space<vmem>>, vector<8x128xf32>
    %c0_1 = arith.constant 0 : index
    %c0_2 = arith.constant 0 : index
    %1 = vector.load %arg3[%c0_1, %c0_2] : memref<8x128xf32, #tpu.memory_space<vmem>>, vector<8x128xf32>
    %c1 = arith.constant 1 : index
    %2 = memref.load %arg1[%c1] : memref<3xf32, #tpu.memory_space<smem>>
    %3 = vector.broadcast %2 : f32 to vector<8x128xf32>
    %4 = arith.mulf %1, %3 : vector<8x128xf32>
    %5 = arith.addf %0, %4 : vector<8x128xf32>
    %c0_3 = arith.constant 0 : index
    %c0_4 = arith.constant 0 : index
    %6 = vector.load %arg4[%c0_3, %c0_4] : memref<8x128xf32, #tpu.memory_space<vmem>>, vector<8x128xf32>
    %c2 = arith.constant 2 : index
    %7 = memref.load %arg1[%c2] : memref<3xf32, #tpu.memory_space<smem>>
    %8 = vector.broadcast %7 : f32 to vector<8x128xf32>
    %9 = arith.mulf %6, %8 : vector<8x128xf32>
    %10 = arith.addf %5, %9 : vector<8x128xf32>
    %c0_5 = arith.constant 0 : index
    %c0_6 = arith.constant 0 : index
    %11 = vector.load %arg5[%c0_5, %c0_6] : memref<8x128xf32, #tpu.memory_space<vmem>>, vector<8x128xf32>
    tpu.vector_store %arg5[%c0_5, %c0_6], %10 {strides = array<i32>} : memref<8x128xf32, #tpu.memory_space<vmem>>, vector<8x128xf32>,
    return
  }
  func.func @transform_0(%arg0: i32, %arg1: memref<3xf32, #tpu.memory_space<smem>>) -> (i32, i32) {
    %c0_i32 = arith.constant 0 : i32
    %c0_i32_0 = arith.constant 0 : i32
    return %arg0, %c0_i32 : i32, i32
  }
  func.func @transform_1(%arg0: i32, %arg1: memref<3xf32, #tpu.memory_space<smem>>) -> (i32, i32) {
    %c0_i32 = arith.constant 0 : i32
    %c0_i32_0 = arith.constant 0 : i32
    return %arg0, %c0_i32 : i32, i32
  }
  func.func @transform_2(%arg0: i32, %arg1: memref<3xf32, #tpu.memory_space<smem>>) -> (i32, i32) {
    %c0_i32 = arith.constant 0 : i32
    %c0_i32_0 = arith.constant 0 : i32
    return %arg0, %c0_i32 : i32, i32
  }
  func.func @transform_3(%arg0: i32, %arg1: memref<3xf32, #tpu.memory_space<smem>>) -> (i32, i32) {
    %c0_i32 = arith.constant 0 : i32
    %c0_i32_0 = arith.constant 0 : i32
    return %arg0, %c0_i32 : i32, i32
  }
}

</mosaic_0001>

<bundles_post_ra>
// kernel: tpu_custom_call.1
= control target key start
LH: loop header
LB: loop body
LE: loop exit
PB: predicated region body
PF: predicated region fallthrough
CT: control target
= control target key end

     0   :  { %s923_s0 = inlined_call_operand.hbm [shape: f32[3], index: 0, kind: input, shape index: {}]   ;;  %s924_s1 = inlined_call_operand.hbm [shape: f32[16,128], index: 1, kind: input, shape index: {}]   ;;  %s925_s2 = inlined_call_operand.hbm [shape: f32[16,128], index: 2, kind: input, shape index: {}]   ;;  %s926_s3 = inlined_call_operand.hbm [shape: f32[16,128], index: 3, kind: input, shape index: {}]   ;;  %s927_s4 = inlined_call_operand.hbm [shape: f32[16,128], index: 4, kind: output, shape index: {}]  }
   0x1   :  { %932 = sst [smem:[#allocation15_spill]] %s925_s2  ;;  %s478_s17 = scalar_lea.hbm %s923_s0, 16 }
   0x2   :  { %p479_p0 = scmp.ne.s32.totalorder %s923_s0, %s478_s17  ;;  %p482_p1 = scmp.lt.u32.totalorder %s478_s17, %s923_s0 }
   0x4   :  { %p484_p2 = pnand %p482_p1, %p479_p0 }
   0x6   :  { %487 = shalt.err (!%p484_p2)  }
   0x7   :  { %s652_s22 = smov [#allocation3]  }
   0x8   :  { %10 = dma.hbm_to_smem %s923_s0, 16, %s652_s22, [#allocation2] }
   0x9   :  { %622 = dma.done.wait [#allocation2], 16 }
   0xa   :  { %623 = vsyncadd [#allocation2], 4294967280 }
   0xb   :  { %12 = sfence }
   0xc   :  { %13 = vsyncpa [#allocation5], 0 }
   0xd   :  { %15 = vsyncpa [#allocation5 + $0x1], 0 }
   0xe   :  { %16 = vsyncpa [#allocation8], 0 }
   0xf   :  { %18 = vsyncpa [#allocation8 + $0x1], 0 }
  0x10   :  { %19 = vsyncpa [#allocation6], 0 }
  0x11   :  { %21 = vsyncpa [#allocation6 + $0x1], 0  ;;  %s694_s25 = smov 0   ;;  %s696_s26 = smov 0  }
  0x12   :  { %s698_s27 = smov 0   ;;  %s700_s28 = smov 0  }
  0x13 LB: > { %s715_s0 = sadd.s32 4294967295, %s650_s28   ;;  %s401_s29 = sadd.s32 4294967294, %s650_s28   ;;  %s650_s28 = sphi %s700_s28, %s951_s28   ;;  %s646_s27 = sphi %s698_s27, %s950_s27   ;;  %s642_s26 = sphi %s696_s26, %s949_s26   ;;  %s638_s25 = sphi %s694_s25, %s948_s25  }
  0x14   : > { %s719_s30 = sadd.s32 1, %s650_s28   ;;  %s34_s5 = sadd.s32 1, %s646_s27 }
  0x15   : > { %s31_s6 = ssub.s32 %s650_s28, %s719_s30  ;;  %p41_p3 = scmp.ne.s32.totalorder %s646_s27, %s642_s26 }
  0x16   : > { %p32_p4 = scmp.eq.s32.totalorder %s31_s6, 0  ;;  %p42_p5 = scmp.eq.s32.totalorder %s650_s28, 0 }
  0x17   : > { %p47_p6 = scmp.ne.s32.totalorder %s642_s26, %s638_s25  ;;  %p48_p7 = scmp.eq.s32.totalorder %s715_s0, 0 }
  0x18   : > { %s731_s7 = scalar_select %p32_p4, %s646_s27, %s34_s5  }
  0x19   : > { %p43_p8 = por %p42_p5, %p41_p3  ;;  %p733_p9 = por %p48_p7, %p47_p6 }
  0x1a   : > { %p123_p10 = scmp.eq.s32.totalorder %s715_s0, 1  ;;  %p129_p11 = scmp.eq.s32.totalorder %s401_s29, 1 }
  0x1b   : > { %s933_s8 = scalar_select %p733_p9, 1, 0 }
  0x1c   : > { %p443_p13 = scmp.lt.s32.totalorder %s650_s28, 2  ;;  %p740_p0 = por %p123_p10, %p41_p3 }
  0x1d   : > { %p744_p1 = por %p129_p11, %p47_p6  ;;  %s149_s11 = sand.u32 1, %s646_s27  }
  0x1e   : > { %s934_s9 = scalar_select %p740_p0, 1, 0 }
  0x1f   : > { %s935_s10 = scalar_select %p744_p1, 1, 0 }
  0x20   : > { %s750_s12 = sshll.u32 %s650_s28, 7  ;;  %s754_s13 = sshll.u32 %s149_s11, 3 }
  0x21   : > { %p756_p2 = pnand %p443_p13, %p43_p8  ;;  %s167_s15 = sand.u32 1, %s650_s28  }
  0x22   : > { %s937_s2 = sld [smem:[#allocation15_spill]]  ;;  %s171_s19 = scalar_lea.vmem [#allocation7], %s754_s13 }
  0x23   : > { %s936_s14 = scalar_select %p756_p2, 1, 0 }
  0x24   : > { %s178_s20 = sshll.u32 %s171_s19, 4  ;;  %s771_s21 = scalar_lea.sflag [#allocation8], %s167_s15  ;;  %s768_s20 = int_to_ptr.vmem [resolvable:$true] %s178_s20 }
  0x25   : > { %p777_p5 = pneg %p756_p2 }
  0x28   : > { %s765_s18 = scalar_lea.hbm %s937_s2, %s750_s12  ;;  %s493_s5 = scalar_lea.hbm %s937_s2, 256 }
  0x29   : > { %s488_s22 = scalar_lea.hbm %s765_s18, 128  ;;  %p494_p8 = scmp.lt.u32.totalorder %s765_s18, %s937_s2 }
  0x2a   : > { %p489_p4 = scmp.ne.s32.totalorder %s765_s18, %s488_s22  ;;  %p495_p10 = scmp.lt.u32.totalorder %s493_s5, %s488_s22 }
  0x2b   : > { %p497_p13 = scmp.lt.u32.totalorder %s488_s22, %s765_s18 }
  0x2c   : > { %p491_p6 = pnand %p777_p5, %p489_p4  ;;  %p496_p11 = por %p495_p10, %p494_p8 }
  0x2e   : > { %p492_p7 = pneg %p491_p6  ;;  %p498_p12 = por %p497_p13, %p496_p11 }
  0x30   : > { %p499_p3 = pnand %p498_p12, %p492_p7 }
  0x32   : > { %502 = shalt.err (!%p499_p3)
}
  0x33   : > { %s503_s15 = scalar_lea.vmem %s768_s20, 128  ;;  %s653_s17 = smov [#allocation7]  }
  0x34   : > { %p504_p4 = scmp.ne.s32.totalorder %s768_s20, %s503_s15  ;;  %s508_s19 = sshll.u32 %s653_s17, 4  ;;  %s509_s19 = int_to_ptr.vmem [resolvable:$false] %s508_s19 }
  0x35   : > { %s510_s24 = scalar_lea.vmem %s509_s19, 256  ;;  %p511_p0 = scmp.lt.s32.totalorder %s768_s20, %s509_s19 }
  0x36   : > { %p506_p6 = pnand %p504_p4, %p777_p5  ;;  %p512_p9 = scmp.lt.s32.totalorder %s510_s24, %s503_s15 }
  0x38   : > { %p507_p1 = pneg %p506_p6  ;;  %p513_p8 = por %p512_p9, %p511_p0 }
  0x3a   : > { %p514_p10 = pnand %p513_p8, %p507_p1 }
  0x3c   : > { %517 = shalt.err (!%p514_p10)
}
  0x3d   : > { %435 = dma.hbm_to_vmem [thread:$0]  (!%p756_p2), %s765_s18, 128, %s768_s20, %s771_s21  }
  0x3e   : > { %p201_p12 = scmp.lt.s32.totalorder %s650_s28, 3  ;;  %s806_s5 = scalar_lea.hbm %s924_s1, %s750_s12 }
  0x3f   : > { %p939_p9 = scmp.ge.s32.totalorder %s650_s28, 1  ;;  %s153_s16 = scalar_lea.vmem [#allocation4], %s754_s13 }
  0x40   : > { %s160_s15 = sshll.u32 %s153_s16, 4  ;;  %s150_s18 = scalar_lea.sflag [#allocation5], %s149_s11  ;;  %s161_s15 = int_to_ptr.vmem [resolvable:$true] %s160_s15 }
  0x41   : > { %p810_p0 = pnand %p939_p9, %p201_p12  ;;  %s518_s20 = scalar_lea.hbm %s806_s5, 128 }
  0x42   : > { %p519_p1 = scmp.ne.s32.totalorder %s806_s5, %s518_s20  ;;  %s523_s24 = scalar_lea.hbm %s924_s1, 256 }
  0x43   : > { %s940_s6 = scalar_select %p810_p0, 1, 0 }
  0x44   : > { %p521_p3 = pnand %p519_p1, %p777_p5  ;;  %p524_p11 = scmp.lt.u32.totalorder %s806_s5, %s924_s1 }
  0x45   : > { %p525_p13 = scmp.lt.u32.totalorder %s523_s24, %s518_s20  ;;  %p527_p6 = scmp.lt.u32.totalorder %s518_s20, %s806_s5 }
  0x46   : > { %p522_p7 = pneg %p521_p3 }
  0x47   : > { %p526_p4 = por %p525_p13, %p524_p11 }
  0x49   : > { %p528_p8 = por %p527_p6, %p526_p4 }
  0x4b   : > { %p529_p10 = pnand %p528_p8, %p522_p7 }
  0x4d   : > { %532 = shalt.err (!%p529_p10)
}
  0x4e   : > { %s533_s11 = scalar_lea.vmem %s161_s15, 128  ;;  %s654_s16 = smov [#allocation4]  }
  0x4f   : > { %p534_p12 = scmp.ne.s32.totalorder %s161_s15, %s533_s11  ;;  %s538_s2 = sshll.u32 %s654_s16, 4  ;;  %s539_s2 = int_to_ptr.vmem [resolvable:$false] %s538_s2 }
  0x50   : > { %s540_s17 = scalar_lea.vmem %s539_s2, 256  ;;  %p541_p3 = scmp.lt.s32.totalorder %s161_s15, %s539_s2 }
  0x51   : > { %p536_p9 = pnand %p534_p12, %p777_p5  ;;  %p542_p0 = scmp.lt.s32.totalorder %s540_s17, %s533_s11 }
  0x53   : > { %p537_p1 = pneg %p536_p9  ;;  %p543_p2 = por %p542_p0, %p541_p3 }
  0x55   : > { %p544_p11 = pnand %p543_p2, %p537_p1 }
  0x57   : > { %547 = shalt.err (!%p544_p11)
}
  0x58   : > { %p941_p13 = scmp.ne.s32.totalorder %s936_s14, 0  ;;  %s838_s24 = scalar_lea.hbm %s926_s3, %s750_s12 }
  0x59   : > { %s189_s2 = scalar_lea.vmem [#allocation9], %s754_s13  ;;  %s548_s29 = scalar_lea.hbm %s838_s24, 128 }
  0x5a   : > { %432 = dma.hbm_to_vmem [thread:$0]  (!%p941_p13), %s806_s5, 128, %s161_s15, %s150_s18  }
  0x5b   : > { %s196_s22 = sshll.u32 %s189_s2, 4  ;;  %p549_p2 = scmp.ne.s32.totalorder %s838_s24, %s548_s29  ;;  %s197_s22 = int_to_ptr.vmem [resolvable:$true] %s196_s22 }
  0x5c   : > { %s553_s5 = scalar_lea.hbm %s926_s3, 256  ;;  %p554_p4 = scmp.lt.u32.totalorder %s838_s24, %s926_s3 }
  0x5d   : > { %p551_p0 = pnand %p549_p2, %p777_p5  ;;  %p555_p6 = scmp.lt.u32.totalorder %s553_s5, %s548_s29 }
  0x5e   : > { %p557_p10 = scmp.lt.u32.totalorder %s548_s29, %s838_s24 }
  0x5f   : > { %p552_p7 = pneg %p551_p0  ;;  %p556_p8 = por %p555_p6, %p554_p4 }
  0x61   : > { %p558_p12 = por %p557_p10, %p556_p8 }
  0x63   : > { %p559_p9 = pnand %p558_p12, %p552_p7 }
  0x65   : > { %562 = shalt.err (!%p559_p9)
}
  0x66   : > { %s563_s12 = scalar_lea.vmem %s197_s22, 128  ;;  %s655_s13 = smov [#allocation9]  }
  0x67   : > { %p564_p1 = scmp.ne.s32.totalorder %s197_s22, %s563_s12  ;;  %s568_s17 = sshll.u32 %s655_s13, 4  ;;  %s569_s17 = int_to_ptr.vmem [resolvable:$false] %s568_s17 }
  0x68   : > { %s570_s20 = scalar_lea.vmem %s569_s17, 256  ;;  %p571_p2 = scmp.lt.s32.totalorder %s197_s22, %s569_s17 }
  0x69   : > { %p566_p3 = pnand %p564_p1, %p777_p5  ;;  %p572_p0 = scmp.lt.s32.totalorder %s570_s20, %s563_s12 }
  0x6b   : > { %p567_p11 = pneg %p566_p3  ;;  %p573_p13 = por %p572_p0, %p571_p2 }
  0x6d   : > { %p574_p4 = pnand %p573_p13, %p567_p11 }
  0x6f   : > { %577 = shalt.err (!%p574_p4)
}
  0x70   : > { %p942_p6 = scmp.ne.s32.totalorder %s936_s14, 0  ;;  %p943_p7 = scmp.ne.s32.totalorder %s940_s6, 0 }
  0x71   : > { %s862_s23 = sand.u32 (!%p943_p7), 1, %s642_s26   ;;  %p944_p5 = scmp.ne.s32.totalorder (!%p943_p7), %s933_s8, 0 }
  0x72   : > { %438 = dma.hbm_to_vmem [thread:$0]  (!%p942_p6), %s838_s24, 128, %s197_s22, %s771_s21  }
  0x73   : > { %205 = sbr.rel (%p943_p7) target bundleno = 153 (0x99), region = 32  ;;  %s411_s19 = sshll.u32 (!%p943_p7), %s862_s23, 3 }
  0x74   : > { %s208_s2 = scalar_lea.sflag (!%p943_p7), [#allocation5], %s862_s23  ;;  %s211_s29 = scalar_lea.vmem (!%p943_p7), [#allocation4], %s411_s19 }
  0x7a   : > { %625 = dma.done.wait (%p944_p5), %s208_s2, 128  }
  0x7b   : > { %627 = vsyncadd (%p944_p5), %s208_s2, 4294967168  ;;  %s216_s14 = sand.u32 1, %s715_s0   ;;  %s220_s6 = scalar_lea.vmem [#allocation7], %s411_s19 }
  0x7c   : > { %s217_s21 = scalar_lea.sflag [#allocation8], %s216_s14 }
  0x7d   : > { %629 = dma.done.wait (%p944_p5), %s217_s21, 256  }
  0x7e   : > { %631 = vsyncadd (%p944_p5), %s217_s21, 4294967040  ;;  %s415_s24 = sld [smem:[#allocation3 + $0x1]]  ;;  %s416_s22 = sld [smem:[#allocation3 + $0x2]]  ;;  %v262_v0 = vld [vmem:[%s211_s29] sm:$0xff]  ;;  %v263_v1 = vld [vmem:[%s220_s6] sm:$0xff] }
  0x7f   : > { %s229_s11 = scalar_lea.vmem [#allocation9], %s411_s19  ;;  %s261_s16 = scalar_lea.vmem [#allocation10], %s411_s19 }
  0x80   : > { %v268_v3 = vld [vmem:[%s229_s11] sm:$0xff]  ;;  %s288_s5 = sshll.u32 %s261_s16, 4  ;;  %s418_s15 = sshll.u32 %s715_s0, 7  ;;  %s876_s5 = int_to_ptr.vmem [resolvable:$true] %s288_s5 }
  0x81   : > { %s881_s12 = scalar_lea.hbm %s927_s4, %s418_s15  ;;  %s275_s13 = scalar_lea.sflag [#allocation6], %s862_s23 }
  0x82   : > { %s578_s17 = scalar_lea.vmem %s876_s5, 128  ;;  %p945_p8 = scmp.ne.s32.totalorder %s934_s9, 0 }
  0x83   : > { %p579_p13 = scmp.ne.s32.totalorder %s876_s5, %s578_s17  ;;  %s656_s0 = smov [#allocation10]  }
  0x84   : > { %v265_v2 = vstv %s415_s24  ;;  %v270_v5 = vstv %s416_s22  ;;  %s582_s20 = sshll.u32 %s656_s0, 4  ;;  %s583_s20 = int_to_ptr.vmem [resolvable:$false] %s582_s20 }
  0x85   : > { %v266_v4 = vmul.f32 %v265_v2, %v263_v1  ;;  %v271_v6 = vmul.f32 %v270_v5, %v268_v3  ;;  %p580_p10 = pnand %p579_p13, %p945_p8  ;;  %s584_s19 = scalar_lea.vmem %s583_s20, 256 }
  0x86   : > { %p585_p9 = scmp.lt.s32.totalorder %s876_s5, %s583_s20  ;;  %p586_p1 = scmp.lt.s32.totalorder %s584_s19, %s578_s17 }
  0x87   : > { %v267_v7 = vadd.f32 %v266_v4, %v262_v0  ;;  %p581_p12 = pneg %p580_p10 }
  0x88   : > { %p587_p3 = por %p586_p1, %p585_p9 }
  0x89   : > { %v272_v8 = vadd.f32 %v271_v6, %v267_v7 }
  0x8a   : > { %p588_p11 = pnand %p587_p3, %p581_p12 }
  0x8b   : > { %273 = vst [vmem:[%s261_s16] sm:$0xff] %v272_v8 }
  0x8c   : > { %591 = shalt.err (!%p588_p11)
}
  0x8d   : > { %s592_s23 = scalar_lea.hbm %s881_s12, 128  ;;  %s596_s14 = scalar_lea.hbm %s927_s4, 256 }
  0x8e   : > { %p593_p2 = scmp.ne.s32.totalorder %s881_s12, %s592_s23  ;;  %p597_p6 = scmp.lt.u32.totalorder %s881_s12, %s927_s4 }
  0x8f   : > { %p598_p7 = scmp.lt.u32.totalorder %s596_s14, %s592_s23  ;;  %p600_p13 = scmp.lt.u32.totalorder %s592_s23, %s881_s12 }
  0x90   : > { %p594_p0 = pnand %p593_p2, %p945_p8 }
  0x91   : > { %p599_p5 = por %p598_p7, %p597_p6 }
  0x92   : > { %p595_p4 = pneg %p594_p0 }
  0x93   : > { %p601_p10 = por %p600_p13, %p599_p5 }
  0x95   : > { %p602_p12 = pnand %p601_p10, %p595_p4 }
  0x97   : > { %605 = shalt.err (!%p602_p12)
}
  0x98   : > { %427 = dma.vmem_to_hbm [thread:$0]  (%p945_p8), %s876_s5, 128, %s881_s12, %s275_s13  }
  0x99 PF: > { %s300_s24 = sand.u32 1, %s638_s25   ;;  %p946_p9 = scmp.ne.s32.totalorder %s935_s10, 0 }
  0x9a   : > { %p947_p1 = scmp.ge.s32.totalorder %s650_s28, 2  ;;  %s301_s22 = scalar_lea.sflag [#allocation6], %s300_s24 }
  0x9c   : > { %p440_p3 = pnand %p947_p1, %p946_p9 }
  0x9e   : > { %633 = dma.done.wait (!%p440_p3), %s301_s22, 128  }
  0x9f   : > { %635 = vsyncadd (!%p440_p3), %s301_s22, 4294967168  ;;  %p24_p11 = scmp.ge.s32.totalorder %s719_s30, 4   ;;  %s948_s25 = smov %s642_s26 }
  0xa0   : > { %s949_s26 = smov %s646_s27  ;;  %s950_s27 = smov %s731_s7 }
  0xa1   : > { %s951_s28 = smov %s719_s30  ;;  %26 = sbr.rel (!%p24_p11) target bundleno = 19 (0x13), region = 101 }
  0xa8   :  { %306 = vsyncpa [#allocation5], 1 }
  0xa9   :  { %308 = vsyncpa [#allocation5 + $0x1], 1 }
  0xaa   :  { %309 = vsyncpa [#allocation8], 1 }
  0xab   :  { %311 = vsyncpa [#allocation8 + $0x1], 1 }
  0xac   :  { %312 = vsyncpa [#allocation6], 1 }
  0xad   :  { %314 = vsyncpa [#allocation6 + $0x1], 1 }

</bundles_post_ra>
